<compile_context>
chip_gen: v7x
topology: tpu7x:2x2x1
jax: 0.10.0
libtpu: 0.0.40
codegen_flags: <defaults>
</compile_context>

<pallas_src>
import math

import jax
import jax.numpy as jnp
from jax.experimental import pallas as pl
from jax.experimental.pallas import tpu as pltpu

# ----- module "hyper-parameters" (deterministic, in-script) -----------------
N_INPUT_DIMS = 3          # encoding.n_input_dims
N_FREQUENCIES = 6         # frequency encoding levels
ENC_OUT_DIMS = N_INPUT_DIMS * 2 * N_FREQUENCIES   # encoding.n_output_dims = 36
INCLUDE_XYZ = True
XYZ_SCALE = 2.0
XYZ_OFFSET = -1.0
N_OUTPUT_DIMS = int(INCLUDE_XYZ) * N_INPUT_DIMS + ENC_OUT_DIMS  # 39


def composite_encoding_kernel(x_ref, o_ref):
    """Channel-major block.

    x_ref: (3, TL)  f32   (lane axis = points, sublane axis = input dims)
    o_ref: (39, TL) out   (lane axis = points, sublane axis = features)
    """
    x = x_ref[...]                                           # (3, TL) f32

    # include_xyz affine part -> rows [0, 3)
    o_ref[0:N_INPUT_DIMS, :] = (x * XYZ_SCALE + XYZ_OFFSET).astype(o_ref.dtype)

    # Frequency encoding, level f -> sin rows [3+6f, 6+6f), cos rows [6+6f, 9+6f).
    # Double-angle recurrence: only level 0 uses the EUP; levels 1..5 are VPU muls.
    s = jnp.sin(x * math.pi)                                 # sin(pi * x)
    c = jnp.cos(x * math.pi)                                 # cos(pi * x)
    for f in range(N_FREQUENCIES):
        base = N_INPUT_DIMS + 2 * f * N_INPUT_DIMS
        o_ref[base:base + N_INPUT_DIMS, :] = s.astype(o_ref.dtype)
        o_ref[base + N_INPUT_DIMS:base + 2 * N_INPUT_DIMS, :] = c.astype(o_ref.dtype)
        if f + 1 < N_FREQUENCIES:
            # sin(2a) = 2 sin(a) cos(a);  cos(2a) = 2 cos(a)^2 - 1
            s, c = 2.0 * s * c, 2.0 * c * c - 1.0


def _composite_encoding_channel_major(x_cm, *, tile_l, out_dtype):
    """x_cm: (3, Np) f32, Np a multiple of tile_l (itself a multiple of 128)."""
    _, n = x_cm.shape
    return pl.pallas_call(
        composite_encoding_kernel,
        out_shape=jax.ShapeDtypeStruct((N_OUTPUT_DIMS, n), out_dtype),
        grid_spec=pltpu.PrefetchScalarGridSpec(
            num_scalar_prefetch=0,
            grid=(n // tile_l,),
            in_specs=[pl.BlockSpec((N_INPUT_DIMS, tile_l), lambda i: (0, i))],
            out_specs=pl.BlockSpec((N_OUTPUT_DIMS, tile_l), lambda i: (0, i)),
        ),
        compiler_params=pltpu.CompilerParams(
            dimension_semantics=("parallel",),   # v7x: 2 TCs share the lane-tile grid
        ),
    )(x_cm)


def composite_encoding(x, *, tile_l=16384, out_dtype=jnp.float32):
    """Module-semantics entry point: x (N, 3) f32 -> (N, 39).

    Internally uses a channel-major, lane-dense layout (transpose/pad at the
    boundary is layout plumbing only). Consumers that can take a (39, N)
    channel-major slab directly should call _composite_encoding_channel_major.
    """
    n, d = x.shape
    assert d == N_INPUT_DIMS
    x_cm = x.T                                              # (3, N)
    tl = min(tile_l, pl.cdiv(n, 128) * 128)                 # lane tile, mult of 128
    n_pad = pl.cdiv(n, tl) * tl
    if n_pad != n:
        x_cm = jnp.pad(x_cm, ((0, 0), (0, n_pad - n)))
    out_cm = _composite_encoding_channel_major(x_cm, tile_l=tl, out_dtype=out_dtype)
    return out_cm[:, :n].T                                  # (N, 39)


def composite_encoding_ref(x):
    """Pure-JAX reference mirroring the PyTorch forward semantics."""
    feats = []
    if INCLUDE_XYZ:
        feats.append(x * XYZ_SCALE + XYZ_OFFSET)
    for f in range(N_FREQUENCIES):
        scale = (2.0 ** f) * math.pi
        feats.append(jnp.sin(x * scale))
        feats.append(jnp.cos(x * scale))
    return jnp.concatenate(feats, axis=-1)


if __name__ == "__main__":
    key = jax.random.PRNGKey(0)
    # Small point batch: 256 points in [0, 1]^3 (typical normalized coords).
    x = jax.random.uniform(key, (256, N_INPUT_DIMS), dtype=jnp.float32)

    out = composite_encoding(x)
    out = jax.block_until_ready(out)

    ref = composite_encoding_ref(x)
    assert out.shape == (256, N_OUTPUT_DIMS), out.shape
    # The double-angle recurrence amplifies phase error ~2x per level; 2e-4 abs
    # tolerance comfortably covers the worst case at level 5 (scale 32*pi) in f32.
    assert jnp.allclose(out, ref, atol=2e-4, rtol=1e-4), "mismatch vs reference"

    print("KERNEL_OK")
</pallas_src>

<mosaic_0001>
module attributes {stable_mosaic.version = 11 : i64} {
  func.func @composite_encoding_kernel(%arg0: i32, %arg1: memref<3x256xf32, #tpu.memory_space<vmem>>, %arg2: memref<39x256xf32, #tpu.memory_space<vmem>>) attributes {dimension_semantics = [#tpu.dimension_semantics<parallel>], iteration_bounds = array<i64: 1>, scalar_prefetch = 0 : i64, scratch_operands = 0 : i64, tpu.core_type = #tpu.core_type<tc>, window_params = [{transform_indices = @transform_0, window_bounds = array<i64: 3, 256>}, {transform_indices = @transform_1, window_bounds = array<i64: 39, 256>}]} {
    %c0 = arith.constant 0 : index
    %c0_0 = arith.constant 0 : index
    %0 = vector.load %arg1[%c0, %c0_0] : memref<3x256xf32, #tpu.memory_space<vmem>>, vector<3x256xf32>
    %cst = arith.constant 2.000000e+00 : f32
    %1 = vector.broadcast %cst : f32 to vector<3x256xf32>
    %2 = arith.mulf %0, %1 : vector<3x256xf32>
    %cst_1 = arith.constant -1.000000e+00 : f32
    %3 = vector.broadcast %cst_1 : f32 to vector<3x256xf32>
    %4 = arith.addf %2, %3 : vector<3x256xf32>
    %c0_2 = arith.constant 0 : index
    %c0_3 = arith.constant 0 : index
    %5 = vector.load %arg2[%c0_2, %c0_3] : memref<39x256xf32, #tpu.memory_space<vmem>>, vector<3x256xf32>
    tpu.vector_store %arg2[%c0_2, %c0_3], %4 {strides = array<i32>} : memref<39x256xf32, #tpu.memory_space<vmem>>, vector<3x256xf32>,
    %cst_4 = arith.constant 3.14159274 : f32
    %6 = vector.broadcast %cst_4 : f32 to vector<3x256xf32>
    %7 = arith.mulf %0, %6 : vector<3x256xf32>
    %8 = math.sin %7 : vector<3x256xf32>
    %cst_5 = arith.constant 3.14159274 : f32
    %9 = vector.broadcast %cst_5 : f32 to vector<3x256xf32>
    %10 = arith.mulf %0, %9 : vector<3x256xf32>
    %11 = math.cos %10 : vector<3x256xf32>
    %c3 = arith.constant 3 : index
    %c0_6 = arith.constant 0 : index
    %12 = vector.load %arg2[%c3, %c0_6] : memref<39x256xf32, #tpu.memory_space<vmem>>, vector<3x256xf32>
    tpu.vector_store %arg2[%c3, %c0_6], %8 {strides = array<i32>} : memref<39x256xf32, #tpu.memory_space<vmem>>, vector<3x256xf32>,
    %c6 = arith.constant 6 : index
    %c0_7 = arith.constant 0 : index
    %13 = vector.load %arg2[%c6, %c0_7] : memref<39x256xf32, #tpu.memory_space<vmem>>, vector<3x256xf32>
    tpu.vector_store %arg2[%c6, %c0_7], %11 {strides = array<i32>} : memref<39x256xf32, #tpu.memory_space<vmem>>, vector<3x256xf32>,
    %cst_8 = arith.constant 2.000000e+00 : f32
    %14 = vector.broadcast %cst_8 : f32 to vector<3x256xf32>
    %15 = arith.mulf %14, %8 : vector<3x256xf32>
    %16 = arith.mulf %15, %11 : vector<3x256xf32>
    %cst_9 = arith.constant 2.000000e+00 : f32
    %17 = vector.broadcast %cst_9 : f32 to vector<3x256xf32>
    %18 = arith.mulf %17, %11 : vector<3x256xf32>
    %19 = arith.mulf %18, %11 : vector<3x256xf32>
    %cst_10 = arith.constant 1.000000e+00 : f32
    %20 = vector.broadcast %cst_10 : f32 to vector<3x256xf32>
    %21 = arith.subf %19, %20 : vector<3x256xf32>
    %c9 = arith.constant 9 : index
    %c0_11 = arith.constant 0 : index
    %22 = vector.load %arg2[%c9, %c0_11] : memref<39x256xf32, #tpu.memory_space<vmem>>, vector<3x256xf32>
    tpu.vector_store %arg2[%c9, %c0_11], %16 {strides = array<i32>} : memref<39x256xf32, #tpu.memory_space<vmem>>, vector<3x256xf32>,
    %c12 = arith.constant 12 : index
    %c0_12 = arith.constant 0 : index
    %23 = vector.load %arg2[%c12, %c0_12] : memref<39x256xf32, #tpu.memory_space<vmem>>, vector<3x256xf32>
    tpu.vector_store %arg2[%c12, %c0_12], %21 {strides = array<i32>} : memref<39x256xf32, #tpu.memory_space<vmem>>, vector<3x256xf32>,
    %cst_13 = arith.constant 2.000000e+00 : f32
    %24 = vector.broadcast %cst_13 : f32 to vector<3x256xf32>
    %25 = arith.mulf %24, %16 : vector<3x256xf32>
    %26 = arith.mulf %25, %21 : vector<3x256xf32>
    %cst_14 = arith.constant 2.000000e+00 : f32
    %27 = vector.broadcast %cst_14 : f32 to vector<3x256xf32>
    %28 = arith.mulf %27, %21 : vector<3x256xf32>
    %29 = arith.mulf %28, %21 : vector<3x256xf32>
    %cst_15 = arith.constant 1.000000e+00 : f32
    %30 = vector.broadcast %cst_15 : f32 to vector<3x256xf32>
    %31 = arith.subf %29, %30 : vector<3x256xf32>
    %c15 = arith.constant 15 : index
    %c0_16 = arith.constant 0 : index
    %32 = vector.load %arg2[%c15, %c0_16] : memref<39x256xf32, #tpu.memory_space<vmem>>, vector<3x256xf32>
    tpu.vector_store %arg2[%c15, %c0_16], %26 {strides = array<i32>} : memref<39x256xf32, #tpu.memory_space<vmem>>, vector<3x256xf32>,
    %c18 = arith.constant 18 : index
    %c0_17 = arith.constant 0 : index
    %33 = vector.load %arg2[%c18, %c0_17] : memref<39x256xf32, #tpu.memory_space<vmem>>, vector<3x256xf32>
    tpu.vector_store %arg2[%c18, %c0_17], %31 {strides = array<i32>} : memref<39x256xf32, #tpu.memory_space<vmem>>, vector<3x256xf32>,
    %cst_18 = arith.constant 2.000000e+00 : f32
    %34 = vector.broadcast %cst_18 : f32 to vector<3x256xf32>
    %35 = arith.mulf %34, %26 : vector<3x256xf32>
    %36 = arith.mulf %35, %31 : vector<3x256xf32>
    %cst_19 = arith.constant 2.000000e+00 : f32
    %37 = vector.broadcast %cst_19 : f32 to vector<3x256xf32>
    %38 = arith.mulf %37, %31 : vector<3x256xf32>
    %39 = arith.mulf %38, %31 : vector<3x256xf32>
    %cst_20 = arith.constant 1.000000e+00 : f32
    %40 = vector.broadcast %cst_20 : f32 to vector<3x256xf32>
    %41 = arith.subf %39, %40 : vector<3x256xf32>
    %c21 = arith.constant 21 : index
    %c0_21 = arith.constant 0 : index
    %42 = vector.load %arg2[%c21, %c0_21] : memref<39x256xf32, #tpu.memory_space<vmem>>, vector<3x256xf32>
    tpu.vector_store %arg2[%c21, %c0_21], %36 {strides = array<i32>} : memref<39x256xf32, #tpu.memory_space<vmem>>, vector<3x256xf32>,
    %c24 = arith.constant 24 : index
    %c0_22 = arith.constant 0 : index
    %43 = vector.load %arg2[%c24, %c0_22] : memref<39x256xf32, #tpu.memory_space<vmem>>, vector<3x256xf32>
    tpu.vector_store %arg2[%c24, %c0_22], %41 {strides = array<i32>} : memref<39x256xf32, #tpu.memory_space<vmem>>, vector<3x256xf32>,
    %cst_23 = arith.constant 2.000000e+00 : f32
    %44 = vector.broadcast %cst_23 : f32 to vector<3x256xf32>
    %45 = arith.mulf %44, %36 : vector<3x256xf32>
    %46 = arith.mulf %45, %41 : vector<3x256xf32>
    %cst_24 = arith.constant 2.000000e+00 : f32
    %47 = vector.broadcast %cst_24 : f32 to vector<3x256xf32>
    %48 = arith.mulf %47, %41 : vector<3x256xf32>
    %49 = arith.mulf %48, %41 : vector<3x256xf32>
    %cst_25 = arith.constant 1.000000e+00 : f32
    %50 = vector.broadcast %cst_25 : f32 to vector<3x256xf32>
    %51 = arith.subf %49, %50 : vector<3x256xf32>
    %c27 = arith.constant 27 : index
    %c0_26 = arith.constant 0 : index
    %52 = vector.load %arg2[%c27, %c0_26] : memref<39x256xf32, #tpu.memory_space<vmem>>, vector<3x256xf32>
    tpu.vector_store %arg2[%c27, %c0_26], %46 {strides = array<i32>} : memref<39x256xf32, #tpu.memory_space<vmem>>, vector<3x256xf32>,
    %c30 = arith.constant 30 : index
    %c0_27 = arith.constant 0 : index
    %53 = vector.load %arg2[%c30, %c0_27] : memref<39x256xf32, #tpu.memory_space<vmem>>, vector<3x256xf32>
    tpu.vector_store %arg2[%c30, %c0_27], %51 {strides = array<i32>} : memref<39x256xf32, #tpu.memory_space<vmem>>, vector<3x256xf32>,
    %cst_28 = arith.constant 2.000000e+00 : f32
    %54 = vector.broadcast %cst_28 : f32 to vector<3x256xf32>
    %55 = arith.mulf %54, %46 : vector<3x256xf32>
    %56 = arith.mulf %55, %51 : vector<3x256xf32>
    %cst_29 = arith.constant 2.000000e+00 : f32
    %57 = vector.broadcast %cst_29 : f32 to vector<3x256xf32>
    %58 = arith.mulf %57, %51 : vector<3x256xf32>
    %59 = arith.mulf %58, %51 : vector<3x256xf32>
    %cst_30 = arith.constant 1.000000e+00 : f32
    %60 = vector.broadcast %cst_30 : f32 to vector<3x256xf32>
    %61 = arith.subf %59, %60 : vector<3x256xf32>
    %c33 = arith.constant 33 : index
    %c0_31 = arith.constant 0 : index
    %62 = vector.load %arg2[%c33, %c0_31] : memref<39x256xf32, #tpu.memory_space<vmem>>, vector<3x256xf32>
    tpu.vector_store %arg2[%c33, %c0_31], %56 {strides = array<i32>} : memref<39x256xf32, #tpu.memory_space<vmem>>, vector<3x256xf32>,
    %c36 = arith.constant 36 : index
    %c0_32 = arith.constant 0 : index
    %63 = vector.load %arg2[%c36, %c0_32] : memref<39x256xf32, #tpu.memory_space<vmem>>, vector<3x256xf32>
    tpu.vector_store %arg2[%c36, %c0_32], %61 {strides = array<i32>} : memref<39x256xf32, #tpu.memory_space<vmem>>, vector<3x256xf32>,
    return
  }
  func.func @transform_0(%arg0: i32) -> (i32, i32) {
    %c0_i32 = arith.constant 0 : i32
    %c0_i32_0 = arith.constant 0 : i32
    return %c0_i32, %arg0 : i32, i32
  }
  func.func @transform_1(%arg0: i32) -> (i32, i32) {
    %c0_i32 = arith.constant 0 : i32
    %c0_i32_0 = arith.constant 0 : i32
    return %c0_i32, %arg0 : i32, i32
  }
}

</mosaic_0001>

<bundles_post_ra>
// kernel: tpu_custom_call.1
= control target key start
LH: loop header
LB: loop body
LE: loop exit
PB: predicated region body
PF: predicated region fallthrough
CT: control target
= control target key end

     0   :  { %6 = vsyncpa [#allocation3], 0  ;;  %s516_s0 = inlined_call_operand.hbm [shape: f32[3,256], index: 0, kind: input, shape index: {}]   ;;  %s517_s1 = inlined_call_operand.hbm [shape: f32[39,256], index: 1, kind: output, shape index: {}]  }
   0x1   :  { %7 = vsyncpa [#allocation4], 0  ;;  %s451_s6 = smov [#allocation2]   ;;  %s403_s10 = scalar_lea.hbm %s516_s0, 128 }
   0x2   :  { %s14_s7 = sshll.u32 %s451_s6, 4  ;;  %p404_p0 = scmp.ne.s32.totalorder %s516_s0, %s403_s10  ;;  %s15_s7 = int_to_ptr.vmem [resolvable:$true] %s14_s7 }
   0x3   :  { %p407_p1 = scmp.lt.u32.totalorder %s403_s10, %s516_s0 }
   0x5   :  { %p409_p2 = pnand %p407_p1, %p404_p0 }
   0x7   :  { %412 = shalt.err (!%p409_p2)
}
   0x8   :  { %s413_s15 = scalar_lea.vmem %s15_s7, 128  ;;  %p418_p4 = scmp.lt.s32.totalorder %s15_s7, %s15_s7 }
   0x9   :  { %p414_p3 = scmp.ne.s32.totalorder %s15_s7, %s413_s15  ;;  %p419_p5 = scmp.lt.s32.totalorder %s413_s15, %s413_s15 }
   0xb   :  { %p420_p6 = por %p419_p5, %p418_p4 }
   0xd   :  { %p421_p7 = pnand %p420_p6, %p414_p3 }
   0xf   :  { %424 = shalt.err (!%p421_p7)
}
  0x10   :  { %17 = dma.hbm_to_vmem [thread:$0]  %s516_s0, 128, %s15_s7, [#allocation3]  }
  0x11   :  { %447 = dma.done.wait [#allocation3], 128  }
  0x12   :  { %448 = vsyncadd [#allocation3], 4294967168  ;;  %v21_v0 = vld [vmem:[#allocation2] sm:$0x77]  ;;  %v452_v15 = vmov 2102212464  }
  0x13   :  { %v22_v1 = vmul.f32 2.0, %v21_v0  ;;  %v483_v2 = vmul.f32 3.1415927, %v21_v0  ;;  %v453_v17 = vmov 920167782   ;;  %s458_s0 = smov [#allocation5]  }
  0x14   :  { %v454_v20 = vmov 683565275   ;;  %v455_v22 = vmov 2475754826   ;;  %v456_v24 = vmov 2131351028  }
  0x15   :  { %v23_v3 = vadd.f32 -1.0, %v22_v1  ;;  %v33_v4 = vand.u32 2139095040, %v483_v2  ;;  %v30_v8 = vand.u32 2147483647, %v483_v2  ;;  %v457_v27 = vmov 1326507024  }
  0x16   :  { %vm32_vm7 = vcmp.lt.s32.totalorder %v483_v2, 0  ;;  %vm122_vm15 = vweird.f32 %v483_v2  ;;  %s360_s18 = sshll.u32 %s458_s0, 4  ;;  %s361_s18 = int_to_ptr.vmem [resolvable:$true] %s360_s18 }
  0x17   :  { %27 = vst [vmem:[#allocation5] sm:$0x7] %v23_v3  ;;  %v34_v5 = vshrl.u32 %v33_v4, 23  ;;  %v25_v6 = vcombine.high %v23_v3, %v23_v3  ;;  %v37_v11 = vand.u32 8388607, %v30_v8  ;;  %s425_s19 = scalar_lea.vmem %s361_s18, 1280  ;;  %p430_p9 = scmp.lt.s32.totalorder %s361_s18, %s361_s18 }
  0x18   :  { %vm31_vm8 = vcmp.le.f32.partialorder %v30_v8, 0.7853982  ;;  %p426_p8 = scmp.ne.s32.totalorder %s361_s18, %s425_s19  ;;  %p431_p10 = scmp.lt.s32.totalorder %s425_s19, %s425_s19 }
  0x19   :  { %v372_v7 = vadd.s32 4294967169, %v34_v5  ;;  %28 = vst [vmem:[#allocation5 + $0x8] sm:$0x7] %v25_v6  ;;  %v38_v19 = vor.u32 8388608, %v37_v11 }
  0x1a   :  { %p432_p11 = por %p431_p10, %p430_p9 }
  0x1b   :  { %v40_v9 = vadd.s32 1, %v372_v7  ;;  %v78_v38 = vshll.u32 %v38_v19, 8 }
  0x1c   :  { %p433_p12 = pnand %p432_p11, %p426_p8 }
  0x1d   :  { %vm41_vm0 = vcmp.gt.s32.totalorder %v40_v9, 0 }
  0x1e   :  { %v42_v10 = vsel %vm41_vm0, %v40_v9, 0 }
  0x1f   :  { %v44_v12 = vand.u32 31, %v42_v10  ;;  %v43_v13 = vshrl.u32 %v42_v10, 5 }
  0x21   :  { %v45_v14 = vsub.s32 32, %v44_v12  ;;  %v56_v16 = vshll.u32 %v452_v15, %v44_v12  ;;  %v59_v18 = vshll.u32 %v453_v17, %v44_v12  ;;  %v47_v21 = vshll.u32 %v454_v20, %v44_v12 }
  0x22   :  { %v50_v23 = vshll.u32 %v455_v22, %v44_v12  ;;  %v53_v25 = vshll.u32 %v456_v24, %v44_v12  ;;  %vm65_vm1 = vcmp.lt.s32.totalorder %v43_v13, 4  ;;  %vm62_vm2 = vcmp.lt.s32.totalorder %v43_v13, 1 }
  0x23   :  { %v57_v26 = vshrl.u32 %v453_v17, %v45_v14  ;;  %v60_v28 = vshrl.u32 %v457_v27, %v45_v14  ;;  %v46_v29 = vshrl.u32 %v454_v20, %v45_v14  ;;  %v48_v30 = vshrl.u32 %v455_v22, %v45_v14 }
  0x24   :  { %v51_v31 = vshrl.u32 %v456_v24, %v45_v14  ;;  %v54_v32 = vshrl.u32 %v452_v15, %v45_v14  ;;  %vm64_vm3 = vcmp.lt.s32.totalorder %v43_v13, 3  ;;  %vm63_vm4 = vcmp.lt.s32.totalorder %v43_v13, 2 }
  0x25   :  { %v58_v33 = vor.u32 %v57_v26, %v56_v16  ;;  %v61_v34 = vor.u32 %v60_v28, %v59_v18  ;;  %v49_v35 = vor.u32 %v48_v30, %v47_v21 }
  0x26   :  { %v52_v36 = vor.u32 %v51_v31, %v50_v23  ;;  %v55_v37 = vor.u32 %v54_v32, %v53_v25 }
  0x27   :  { %v71_v39 = vsel %vm65_vm1, %v58_v33, 920167782  ;;  %v75_v40 = vsel %vm65_vm1, %v61_v34, 1326507024  ;;  %v66_v41 = vsel %vm62_vm2, %v46_v29, %v49_v35 }
  0x28   :  { %v67_v42 = vsel %vm65_vm1, %v55_v37, 2102212464  ;;  %v70_v43 = vsel %vm62_vm2, %v49_v35, %v52_v36  ;;  %v72_v44 = vsel %vm64_vm3, %v55_v37, %v71_v39  ;;  %v74_v45 = vsel %vm62_vm2, %v52_v36, %v55_v37 }
  0x29   :  { %v68_v46 = vsel %vm64_vm3, %v52_v36, %v67_v42  ;;  %v73_v47 = vsel %vm63_vm4, %v70_v43, %v72_v44  ;;  %v76_v48 = vsel %vm64_vm3, %v58_v33, %v75_v40 }
  0x2a   :  { %v69_v49 = vsel %vm63_vm4, %v66_v41, %v68_v46  ;;  %v77_v50 = vsel %vm63_vm4, %v74_v45, %v76_v48  ;;  %v489_v51 = vmul.u32.u64.low %v78_v38, %v73_v47  ;;  %v490_v52 = vmul.u32.u64.high %v78_v38, %v73_v47, %v489_v51 }
  0x2b   :  { %v492_v53 = vmul.u32.u64.low %v78_v38, %v77_v50  ;;  %v493_v54 = vmul.u32.u64.high %v78_v38, %v77_v50, %v492_v53  ;;  %v85_v55 = vmul.u32 %v78_v38, %v69_v49 }
  0x2c   :  { %v88_v56 = vadd.s32 1, %v490_v52 }
  0x2d   :  { %vm87_vm5 = vc.u32 %v493_v54, %v489_v51  ;;  %v86_v4 = vadd.s32 %v489_v51, %v493_v54 }
  0x2e   :  { %v89_v57 = vsel %vm87_vm5, %v88_v56, %v490_v52 }
  0x2f   :  { %v90_v58 = vadd.s32 %v89_v57, %v85_v55 }
  0x31   :  { %v91_v59 = vadd.s32 536870912, %v90_v58 }
  0x33   :  { %v92_v60 = vshrl.u32 %v91_v59, 30 }
  0x35   :  { %v93_v61 = vshll.u32 %v92_v60, 30  ;;  %v116_v18 = vsub.s32 4, %v92_v60 }
  0x37   :  { %v94_v62 = vsub.s32 %v90_v58, %v93_v61  ;;  %v117_v21 = vsel %vm32_vm7, %v116_v18, %v92_v60 }
  0x38   :  { %v119_v23 = vsel %vm31_vm8, 0, %v117_v21 }
  0x39   :  { %v96_v63 = vsub.s32 0, %v94_v62  ;;  %v123_v24 = vadd.s32 3, %v119_v23  ;;  %v227_v26 = vand.u32 3, %v119_v23 }
  0x3b   :  { %v373_v0 = vmin.u32 %v96_v63, %v94_v62  ;;  %v124_v25 = vand.u32 3, %v123_v24  ;;  %vm232_vm10 = vcmp.eq.s32.totalorder %v227_v26, 2  ;;  %vm229_vm12 = vcmp.eq.s32.totalorder %v227_v26, 0 }
  0x3c   :  { %vm228_vm14 = vcmp.lt.s32.totalorder %v227_v26, 2 }
  0x3d   :  { %v98_v1 = vclz %v373_v0  ;;  %vm129_vm9 = vcmp.eq.s32.totalorder %v124_v25, 2  ;;  %vm126_vm11 = vcmp.eq.s32.totalorder %v124_v25, 0  ;;  %vm125_vm13 = vcmp.lt.s32.totalorder %v124_v25, 2 }
  0x3f   :  { %v374_v3 = vadd.s32 4294967294, %v98_v1 }
  0x41   :  { %vm375_vm6 = vcmp.lt.s32.totalorder %v374_v3, 0 }
  0x42   :  { %v101_v5 = vsel %vm375_vm6, 0, %v374_v3 }
  0x43   :  { %v102_v6 = vsub.s32 32, %v101_v5  ;;  %v103_v7 = vshll.u32 %v94_v62, %v101_v5  ;;  %v106_v9 = vsub.s32 4294967266, %v101_v5 }
  0x45   :  { %v104_v10 = vshrl.u32 %v86_v4, %v102_v6  ;;  %v107_v11 = vadd.s32 127, %v106_v9 }
  0x47   :  { %v105_v12 = vor.u32 %v104_v10, %v103_v7  ;;  %v108_v13 = vshll.u32 %v107_v11, 23 }
  0x49   :  { %v109_v14 = vor.u32 4788187, %v108_v13  ;;  %v112_v15 = vcvt.s32.f32 %v105_v12 }
  0x4b   :  { %v110_v16 = vand.u32 2147483647, %v109_v14 }
  0x4d   :  { %v113_v17 = vmul.f32 %v112_v15, %v110_v16 }
  0x4f   :  { %v114_v19 = vxor.u32 2147483648, %v113_v17 }
  0x51   :  { %v115_v20 = vsel %vm32_vm7, %v114_v19, %v113_v17 }
  0x52   :  { %v118_v22 = vsel %vm31_vm8, %v483_v2, %v115_v20 }
  0x53   :  { %399 = vcosq.f32 %v118_v22 }
  0x54   :  { %401 = vsinq.f32 %v118_v22 }
  0x5d   :  { %v400_v27 = vpop.eup %399 }
  0x5e   :  { %v402_v28 = vpop.eup %401  ;;  %v130_v29 = vxor.u32 2147483648, %v400_v27 }
  0x5f   :  { %v127_v8 = vxor.u32 2147483648, %v402_v28 }
  0x60   :  { %v131_v30 = vsel %vm129_vm9, %v130_v29, %v402_v28  ;;  %v234_v31 = vsel %vm232_vm10, %v130_v29, %v402_v28 }
  0x61   :  { %v128_v32 = vsel %vm126_vm11, %v400_v27, %v127_v8  ;;  %v231_v33 = vsel %vm229_vm12, %v400_v27, %v127_v8 }
  0x62   :  { %v132_v34 = vsel %vm125_vm13, %v128_v32, %v131_v30  ;;  %v235_v35 = vsel %vm228_vm14, %v231_v33, %v234_v31 }
  0x63   :  { %v133_v36 = vsel %vm122_vm15, nan, %v132_v34  ;;  %v236_v37 = vsel %vm122_vm15, nan, %v235_v35 }
  0x64   :  { %v239_v38 = vrot.slane %v133_v36, 5  ;;  %v255_v39 = vmul.f32 2.0, %v133_v36  ;;  %v257_v40 = vmul.f32 2.0, %v236_v37  ;;  %v238_v41 = vcombine.high %v133_v36, %v133_v36 }
  0x65   :  { %v247_v42 = vrot.slane %v236_v37, 2  ;;  %v246_v43 = vcombine.high %v236_v37, %v236_v37 }
  0x66   :  { %243 = vst [vmem:[#allocation5] sm:$0x38] %v239_v38  ;;  %v258_v44 = vmul.f32 %v257_v40, %v236_v37  ;;  %v240_v45 = vrot.slane %v238_v41, 5  ;;  %v256_v46 = vmul.f32 %v255_v39, %v236_v37 }
  0x67   :  { %251 = vst [vmem:[#allocation5 + $0x10] ss:$-12 sps:$4 sm:$0xc1] %v247_v42   ;;  %v248_v2 = vrot.slane %v246_v43, 2 }
  0x68   :  { %v380_v47 = vadd.f32 -1.0, %v258_v44  ;;  %244 = vst [vmem:[#allocation5 + $0x8] sm:$0x38] %v240_v45  ;;  %v262_v48 = vrot.slane %v256_v46, 7  ;;  %v261_v49 = vcombine.high %v256_v46, %v256_v46  ;;  %v273_v50 = vmul.f32 2.0, %v256_v46 }
  0x69   :  { %252 = vst [vmem:[#allocation5 + $0x18] ss:$-12 sps:$4 sm:$0xc1] %v248_v2  }
  0x6a   :  { %272 = vst [vmem:[#allocation5 + $0x18] sm:$0x70] %v380_v47  ;;  %266 = vst [vmem:[#allocation5 + $0x10] sm:$0xe] %v262_v48  ;;  %v263_v51 = vrot.slane %v261_v49, 7  ;;  %v269_v52 = vcombine.low %v380_v47, %v380_v47  ;;  %v274_v53 = vmul.f32 %v380_v47, %v273_v50  ;;  %v275_v54 = vmul.f32 2.0, %v380_v47 }
  0x6c   :  { %267 = vst [vmem:[#allocation5 + $0x18] sm:$0xe] %v263_v51  ;;  %271 = vst [vmem:[#allocation5 + $0x10] sm:$0x70] %v269_v52  ;;  %v280_v55 = vrot.slane %v274_v53, 1  ;;  %v279_v56 = vcombine.high %v274_v53, %v274_v53  ;;  %v276_v57 = vmul.f32 %v380_v47, %v275_v54  ;;  %v296_v58 = vmul.f32 2.0, %v274_v53 }
  0x6e   :  { %284 = vst [vmem:[#allocation5 + $0x20] ss:$-12 sps:$4 sm:$0x83] %v280_v55   ;;  %v281_v59 = vrot.slane %v279_v56, 1  ;;  %v381_v60 = vadd.f32 -1.0, %v276_v57 }
  0x70   :  { %285 = vst [vmem:[#allocation5 + $0x28] ss:$-12 sps:$4 sm:$0x83] %v281_v59   ;;  %v290_v61 = vrot.slane %v381_v60, 6  ;;  %v289_v62 = vcombine.high %v381_v60, %v381_v60  ;;  %v297_v63 = vmul.f32 %v381_v60, %v296_v58  ;;  %v298_v0 = vmul.f32 2.0, %v381_v60 }
  0x72   :  { %294 = vst [vmem:[#allocation5 + $0x20] sm:$0x1c] %v290_v61  ;;  %v291_v1 = vrot.slane %v289_v62, 6  ;;  %v303_v3 = vrot.slane %v297_v63, 3  ;;  %v302_v4 = vcombine.high %v297_v63, %v297_v63  ;;  %v299_v5 = vmul.f32 %v381_v60, %v298_v0 }
  0x73   :  { %v314_v6 = vmul.f32 2.0, %v297_v63 }
  0x74   :  { %295 = vst [vmem:[#allocation5 + $0x28] sm:$0x1c] %v291_v1  ;;  %307 = vst [vmem:[#allocation5 + $0x20] sm:$0xe0] %v303_v3  ;;  %v304_v7 = vrot.slane %v302_v4, 3  ;;  %v382_v9 = vadd.f32 -1.0, %v299_v5 }
  0x76   :  { %308 = vst [vmem:[#allocation5 + $0x28] sm:$0xe0] %v304_v7  ;;  %312 = vst [vmem:[#allocation5 + $0x30] sm:$0x7] %v382_v9  ;;  %v310_v10 = vcombine.high %v382_v9, %v382_v9  ;;  %v315_v11 = vmul.f32 %v382_v9, %v314_v6  ;;  %v316_v12 = vmul.f32 2.0, %v382_v9 }
  0x78   :  { %313 = vst [vmem:[#allocation5 + $0x38] sm:$0x7] %v310_v10  ;;  %v321_v13 = vrot.slane %v315_v11, 5  ;;  %v320_v14 = vcombine.high %v315_v11, %v315_v11  ;;  %v317_v15 = vmul.f32 %v382_v9, %v316_v12  ;;  %v337_v16 = vmul.f32 2.0, %v315_v11 }
  0x7a   :  { %325 = vst [vmem:[#allocation5 + $0x30] sm:$0x38] %v321_v13  ;;  %v322_v17 = vrot.slane %v320_v14, 5  ;;  %v383_v18 = vadd.f32 -1.0, %v317_v15 }
  0x7c   :  { %326 = vst [vmem:[#allocation5 + $0x38] sm:$0x38] %v322_v17  ;;  %v329_v19 = vrot.slane %v383_v18, 2  ;;  %v328_v20 = vcombine.high %v383_v18, %v383_v18  ;;  %v338_v21 = vmul.f32 %v383_v18, %v337_v16  ;;  %v339_v22 = vmul.f32 2.0, %v383_v18 }
  0x7e   :  { %333 = vst [vmem:[#allocation5 + $0x40] ss:$-12 sps:$4 sm:$0xc1] %v329_v19   ;;  %v330_v23 = vrot.slane %v328_v20, 2  ;;  %v344_v24 = vrot.slane %v338_v21, 7  ;;  %v343_v25 = vcombine.high %v338_v21, %v338_v21  ;;  %v340_v26 = vmul.f32 %v383_v18, %v339_v22 }
  0x80   :  { %334 = vst [vmem:[#allocation5 + $0x48] ss:$-12 sps:$4 sm:$0xc1] %v330_v23   ;;  %348 = vst [vmem:[#allocation5 + $0x40] sm:$0xe] %v344_v24  ;;  %v345_v27 = vrot.slane %v343_v25, 7 }
  0x81   :  { %v384_v28 = vadd.f32 -1.0, %v340_v26 }
  0x82   :  { %349 = vst [vmem:[#allocation5 + $0x48] sm:$0xe] %v345_v27 }
  0x83   :  { %v351_v29 = vcombine.low %v384_v28, %v384_v28  ;;  %354 = vst [vmem:[#allocation5 + $0x48] sm:$0x70] %v384_v28 }
  0x85   :  { %353 = vst [vmem:[#allocation5 + $0x40] sm:$0x70] %v351_v29 }
  0x86   :  { %436 = shalt.err (!%p433_p12)
}
  0x87   :  { %s437_s22 = scalar_lea.hbm %s517_s1, 1280 }
  0x88   :  { %p438_p13 = scmp.ne.s32.totalorder %s517_s1, %s437_s22  ;;  %p441_p0 = scmp.lt.u32.totalorder %s437_s22, %s517_s1 }
  0x8a   :  { %p443_p1 = pnand %p441_p0, %p438_p13 }
  0x8c   :  { %446 = shalt.err (!%p443_p1)
}
  0x8d   :  { %s459_s27 = smov 256   ;;  %s460_s28 = smov 16  }
  0x8e   :  { %366 = dma.vmem_to_hbm [thread:$0]  %s361_s18, 1280, %s517_s1, [#allocation4], %s459_s27, %s459_s27, %s460_s28  }
  0x8f   :  { %449 = dma.done.wait [#allocation4], 1280  }
  0x90   :  { %450 = vsyncadd [#allocation4], 4294966016 }
  0x91   :  { %370 = vsyncpa [#allocation3], 1 }
  0x92   :  { %371 = vsyncpa [#allocation4], 1 }

</bundles_post_ra>
